<compile_context>
chip_gen: v7x
topology: tpu7x:2x2x1
jax: 0.10.0
libtpu: 0.0.40
codegen_flags: <defaults>
</compile_context>

<pallas_src>
import jax
import jax.numpy as jnp
from jax.experimental import pallas as pl
from jax.experimental.pallas import tpu as pltpu

TAU = 1e-4
LANES = 128      # vreg lane width
SUBLANES = 8     # f32 vreg sublane count


def _round_up(a, b):
    return ((a + b - 1) // b) * b


def net_kernel(w1_ref, b1_ref, w2_ref, b2_ref, w3_ref, b3_ref, w4_ref, b4_ref,
               x_ref, o_ref):
    """One (tile_rows, 128) slab of samples; weights are SMEM scalars.

    Every layer is expressed as scalar-broadcast VPU FMAs (no MXU, no padded
    lanes). The (1 - tau) penal factor is pre-folded into w2/b2/w3/b3.
    """
    x = x_ref[...]                                           # (tile_rows, 128)

    # fc_1: Linear(1, 4) -> four feature planes (one per output feature).
    h = [w1_ref[f] * x + b1_ref[f] for f in range(4)]

    # fc_2 / fc_3: residual + penal_connection(Linear(4, 4)(.)), K=4 -> 4 FMAs.
    for w_ref, b_ref in ((w2_ref, b2_ref), (w3_ref, b3_ref)):
        z = [w_ref[f, 0] * h[0] + w_ref[f, 1] * h[1]
             + w_ref[f, 2] * h[2] + w_ref[f, 3] * h[3] + b_ref[f]
             for f in range(4)]
        h = [h[f] + z[f] for f in range(4)]

    # fc_4: Linear(4, 1) -> lane-dense output slab.
    o_ref[...] = (w4_ref[0] * h[0] + w4_ref[1] * h[1]
                  + w4_ref[2] * h[2] + w4_ref[3] * h[3] + b4_ref[0])


def prepare_params(params, tau=TAU):
    """One-time param prep (hoisted out of the forward): fold the (1 - tau)
    penal factor into the branch weights/biases and lay weights out for
    scalar-indexed SMEM access."""
    w1, b1, w2, b2, w3, b3, w4, b4 = params   # weights stored as (fan_in, fan_out)
    f32 = lambda a: jnp.asarray(a, jnp.float32)
    s = jnp.float32(1.0 - tau)
    return (
        f32(w1).reshape(4),        # (1,4) -> (4,):  h1[f] = w1[f] * x + b1[f]
        f32(b1),                   # (4,)
        (s * f32(w2)).T,           # (4,4): [f, k] = coeff of input k for output f
        s * f32(b2),               # (4,)
        (s * f32(w3)).T,           # (4,4)
        s * f32(b3),               # (4,)
        f32(w4).reshape(4),        # (4,1) -> (4,)
        f32(b4),                   # (1,)
    )


def net_forward(x, prepared_params, tile_rows=512):
    """x: (B, 1) float32.  Returns (B, 1) float32."""
    B = x.shape[0]
    x_flat = jnp.asarray(x, jnp.float32).reshape(B)

    # Pack batch into a (rows, 128) slab: one sample per element, zero lane
    # padding. Pad only the ragged tail (sliced off at the end).
    rows = _round_up(_round_up(B, LANES) // LANES, SUBLANES)
    tile_rows = _round_up(max(SUBLANES, min(tile_rows, rows)), SUBLANES)
    rows = _round_up(rows, tile_rows)
    b_pad = rows * LANES
    if b_pad != B:
        x_flat = jnp.pad(x_flat, (0, b_pad - B))
    x2d = x_flat.reshape(rows, LANES)

    out2d = pl.pallas_call(
        net_kernel,
        out_shape=jax.ShapeDtypeStruct((rows, LANES), jnp.float32),
        grid_spec=pltpu.PrefetchScalarGridSpec(
            num_scalar_prefetch=8,        # weights/biases -> SMEM, grid-resident
            grid=(rows // tile_rows,),
            in_specs=[pl.BlockSpec((tile_rows, LANES), lambda i, *_: (i, 0))],
            out_specs=pl.BlockSpec((tile_rows, LANES), lambda i, *_: (i, 0)),
        ),
        compiler_params=pltpu.CompilerParams(
            dimension_semantics=("parallel",),   # megacore-shard batch on v7x
        ),
    )(*prepared_params, x2d)

    out_flat = out2d.reshape(b_pad)
    if b_pad != B:
        out_flat = out_flat[:B]
    return out_flat.reshape(B, 1)


def init_params(key):
    """Deterministic init; weights stored as (fan_in, fan_out)."""
    ks = jax.random.split(key, 8)

    def lin(kw, kb, fan_in, fan_out):
        bound = 1.0 / jnp.sqrt(fan_in)
        w = jax.random.uniform(kw, (fan_in, fan_out), jnp.float32, -bound, bound)
        b = jax.random.uniform(kb, (fan_out,), jnp.float32, -bound, bound)
        return w, b

    w1, b1 = lin(ks[0], ks[1], 1, 4)
    w2, b2 = lin(ks[2], ks[3], 4, 4)
    w3, b3 = lin(ks[4], ks[5], 4, 4)
    w4, b4 = lin(ks[6], ks[7], 4, 1)
    return (w1, b1, w2, b2, w3, b3, w4, b4)


def reference_forward(x, params):
    """Pure-JAX reference for correctness checking."""
    w1, b1, w2, b2, w3, b3, w4, b4 = params
    h1 = x @ w1 + b1
    h2 = h1 + (1.0 - TAU) * (h1 @ w2 + b2)
    h3 = h2 + (1.0 - TAU) * (h2 @ w3 + b3)
    return h3 @ w4 + b4


if __name__ == "__main__":
    key = jax.random.PRNGKey(0)
    k_x1, k_x2, k_p = jax.random.split(key, 3)
    params = init_params(k_p)
    prepared = prepare_params(params)

    # 1) Lane-aligned batch exercising a multi-step pipelined grid (grid=(4,)).
    B1 = 4096
    x1 = jax.random.normal(k_x1, (B1, 1), jnp.float32)
    out1 = jax.block_until_ready(net_forward(x1, prepared, tile_rows=8))
    ref1 = reference_forward(x1, params)
    assert out1.shape == (B1, 1), out1.shape
    assert jnp.allclose(out1, ref1, atol=1e-5, rtol=1e-5)

    # 2) Ragged batch exercising the pad-and-slice tail path.
    B2 = 1000
    x2 = jax.random.normal(k_x2, (B2, 1), jnp.float32)
    out2 = jax.block_until_ready(net_forward(x2, prepared))
    ref2 = reference_forward(x2, params)
    assert out2.shape == (B2, 1), out2.shape
    assert jnp.allclose(out2, ref2, atol=1e-5, rtol=1e-5)

    print("KERNEL_OK")
</pallas_src>

<mosaic_0001>
module attributes {stable_mosaic.version = 11 : i64} {
  func.func @net_kernel(%arg0: i32, %arg1: memref<4xf32, #tpu.memory_space<smem>>, %arg2: memref<4xf32, #tpu.memory_space<smem>>, %arg3: memref<4x4xf32, #tpu.memory_space<smem>>, %arg4: memref<4xf32, #tpu.memory_space<smem>>, %arg5: memref<4x4xf32, #tpu.memory_space<smem>>, %arg6: memref<4xf32, #tpu.memory_space<smem>>, %arg7: memref<4xf32, #tpu.memory_space<smem>>, %arg8: memref<1xf32, #tpu.memory_space<smem>>, %arg9: memref<8x128xf32, #tpu.memory_space<vmem>>, %arg10: memref<8x128xf32, #tpu.memory_space<vmem>>) attributes {dimension_semantics = [#tpu.dimension_semantics<parallel>], iteration_bounds = array<i64: 4>, scalar_prefetch = 8 : i64, scratch_operands = 0 : i64, tpu.core_type = #tpu.core_type<tc>, window_params = [{transform_indices = @transform_0, window_bounds = array<i64: 8, 128>}, {transform_indices = @transform_1, window_bounds = array<i64: 8, 128>}]} {
    %c0 = arith.constant 0 : index
    %c0_0 = arith.constant 0 : index
    %0 = vector.load %arg9[%c0, %c0_0] : memref<8x128xf32, #tpu.memory_space<vmem>>, vector<8x128xf32>
    %c0_1 = arith.constant 0 : index
    %1 = memref.load %arg1[%c0_1] : memref<4xf32, #tpu.memory_space<smem>>
    %2 = vector.broadcast %1 : f32 to vector<8x128xf32>
    %3 = arith.mulf %2, %0 : vector<8x128xf32>
    %c0_2 = arith.constant 0 : index
    %4 = memref.load %arg2[%c0_2] : memref<4xf32, #tpu.memory_space<smem>>
    %5 = vector.broadcast %4 : f32 to vector<8x128xf32>
    %6 = arith.addf %3, %5 : vector<8x128xf32>
    %c1 = arith.constant 1 : index
    %7 = memref.load %arg1[%c1] : memref<4xf32, #tpu.memory_space<smem>>
    %8 = vector.broadcast %7 : f32 to vector<8x128xf32>
    %9 = arith.mulf %8, %0 : vector<8x128xf32>
    %c1_3 = arith.constant 1 : index
    %10 = memref.load %arg2[%c1_3] : memref<4xf32, #tpu.memory_space<smem>>
    %11 = vector.broadcast %10 : f32 to vector<8x128xf32>
    %12 = arith.addf %9, %11 : vector<8x128xf32>
    %c2 = arith.constant 2 : index
    %13 = memref.load %arg1[%c2] : memref<4xf32, #tpu.memory_space<smem>>
    %14 = vector.broadcast %13 : f32 to vector<8x128xf32>
    %15 = arith.mulf %14, %0 : vector<8x128xf32>
    %c2_4 = arith.constant 2 : index
    %16 = memref.load %arg2[%c2_4] : memref<4xf32, #tpu.memory_space<smem>>
    %17 = vector.broadcast %16 : f32 to vector<8x128xf32>
    %18 = arith.addf %15, %17 : vector<8x128xf32>
    %c3 = arith.constant 3 : index
    %19 = memref.load %arg1[%c3] : memref<4xf32, #tpu.memory_space<smem>>
    %20 = vector.broadcast %19 : f32 to vector<8x128xf32>
    %21 = arith.mulf %20, %0 : vector<8x128xf32>
    %c3_5 = arith.constant 3 : index
    %22 = memref.load %arg2[%c3_5] : memref<4xf32, #tpu.memory_space<smem>>
    %23 = vector.broadcast %22 : f32 to vector<8x128xf32>
    %24 = arith.addf %21, %23 : vector<8x128xf32>
    %c0_6 = arith.constant 0 : index
    %c0_7 = arith.constant 0 : index
    %25 = memref.load %arg3[%c0_6, %c0_7] : memref<4x4xf32, #tpu.memory_space<smem>>
    %26 = vector.broadcast %25 : f32 to vector<8x128xf32>
    %27 = arith.mulf %26, %6 : vector<8x128xf32>
    %c0_8 = arith.constant 0 : index
    %c1_9 = arith.constant 1 : index
    %28 = memref.load %arg3[%c0_8, %c1_9] : memref<4x4xf32, #tpu.memory_space<smem>>
    %29 = vector.broadcast %28 : f32 to vector<8x128xf32>
    %30 = arith.mulf %29, %12 : vector<8x128xf32>
    %31 = arith.addf %27, %30 : vector<8x128xf32>
    %c0_10 = arith.constant 0 : index
    %c2_11 = arith.constant 2 : index
    %32 = memref.load %arg3[%c0_10, %c2_11] : memref<4x4xf32, #tpu.memory_space<smem>>
    %33 = vector.broadcast %32 : f32 to vector<8x128xf32>
    %34 = arith.mulf %33, %18 : vector<8x128xf32>
    %35 = arith.addf %31, %34 : vector<8x128xf32>
    %c0_12 = arith.constant 0 : index
    %c3_13 = arith.constant 3 : index
    %36 = memref.load %arg3[%c0_12, %c3_13] : memref<4x4xf32, #tpu.memory_space<smem>>
    %37 = vector.broadcast %36 : f32 to vector<8x128xf32>
    %38 = arith.mulf %37, %24 : vector<8x128xf32>
    %39 = arith.addf %35, %38 : vector<8x128xf32>
    %c0_14 = arith.constant 0 : index
    %40 = memref.load %arg4[%c0_14] : memref<4xf32, #tpu.memory_space<smem>>
    %41 = vector.broadcast %40 : f32 to vector<8x128xf32>
    %42 = arith.addf %39, %41 : vector<8x128xf32>
    %c1_15 = arith.constant 1 : index
    %c0_16 = arith.constant 0 : index
    %43 = memref.load %arg3[%c1_15, %c0_16] : memref<4x4xf32, #tpu.memory_space<smem>>
    %44 = vector.broadcast %43 : f32 to vector<8x128xf32>
    %45 = arith.mulf %44, %6 : vector<8x128xf32>
    %c1_17 = arith.constant 1 : index
    %c1_18 = arith.constant 1 : index
    %46 = memref.load %arg3[%c1_17, %c1_18] : memref<4x4xf32, #tpu.memory_space<smem>>
    %47 = vector.broadcast %46 : f32 to vector<8x128xf32>
    %48 = arith.mulf %47, %12 : vector<8x128xf32>
    %49 = arith.addf %45, %48 : vector<8x128xf32>
    %c1_19 = arith.constant 1 : index
    %c2_20 = arith.constant 2 : index
    %50 = memref.load %arg3[%c1_19, %c2_20] : memref<4x4xf32, #tpu.memory_space<smem>>
    %51 = vector.broadcast %50 : f32 to vector<8x128xf32>
    %52 = arith.mulf %51, %18 : vector<8x128xf32>
    %53 = arith.addf %49, %52 : vector<8x128xf32>
    %c1_21 = arith.constant 1 : index
    %c3_22 = arith.constant 3 : index
    %54 = memref.load %arg3[%c1_21, %c3_22] : memref<4x4xf32, #tpu.memory_space<smem>>
    %55 = vector.broadcast %54 : f32 to vector<8x128xf32>
    %56 = arith.mulf %55, %24 : vector<8x128xf32>
    %57 = arith.addf %53, %56 : vector<8x128xf32>
    %c1_23 = arith.constant 1 : index
    %58 = memref.load %arg4[%c1_23] : memref<4xf32, #tpu.memory_space<smem>>
    %59 = vector.broadcast %58 : f32 to vector<8x128xf32>
    %60 = arith.addf %57, %59 : vector<8x128xf32>
    %c2_24 = arith.constant 2 : index
    %c0_25 = arith.constant 0 : index
    %61 = memref.load %arg3[%c2_24, %c0_25] : memref<4x4xf32, #tpu.memory_space<smem>>
    %62 = vector.broadcast %61 : f32 to vector<8x128xf32>
    %63 = arith.mulf %62, %6 : vector<8x128xf32>
    %c2_26 = arith.constant 2 : index
    %c1_27 = arith.constant 1 : index
    %64 = memref.load %arg3[%c2_26, %c1_27] : memref<4x4xf32, #tpu.memory_space<smem>>
    %65 = vector.broadcast %64 : f32 to vector<8x128xf32>
    %66 = arith.mulf %65, %12 : vector<8x128xf32>
    %67 = arith.addf %63, %66 : vector<8x128xf32>
    %c2_28 = arith.constant 2 : index
    %c2_29 = arith.constant 2 : index
    %68 = memref.load %arg3[%c2_28, %c2_29] : memref<4x4xf32, #tpu.memory_space<smem>>
    %69 = vector.broadcast %68 : f32 to vector<8x128xf32>
    %70 = arith.mulf %69, %18 : vector<8x128xf32>
    %71 = arith.addf %67, %70 : vector<8x128xf32>
    %c2_30 = arith.constant 2 : index
    %c3_31 = arith.constant 3 : index
    %72 = memref.load %arg3[%c2_30, %c3_31] : memref<4x4xf32, #tpu.memory_space<smem>>
    %73 = vector.broadcast %72 : f32 to vector<8x128xf32>
    %74 = arith.mulf %73, %24 : vector<8x128xf32>
    %75 = arith.addf %71, %74 : vector<8x128xf32>
    %c2_32 = arith.constant 2 : index
    %76 = memref.load %arg4[%c2_32] : memref<4xf32, #tpu.memory_space<smem>>
    %77 = vector.broadcast %76 : f32 to vector<8x128xf32>
    %78 = arith.addf %75, %77 : vector<8x128xf32>
    %c3_33 = arith.constant 3 : index
    %c0_34 = arith.constant 0 : index
    %79 = memref.load %arg3[%c3_33, %c0_34] : memref<4x4xf32, #tpu.memory_space<smem>>
    %80 = vector.broadcast %79 : f32 to vector<8x128xf32>
    %81 = arith.mulf %80, %6 : vector<8x128xf32>
    %c3_35 = arith.constant 3 : index
    %c1_36 = arith.constant 1 : index
    %82 = memref.load %arg3[%c3_35, %c1_36] : memref<4x4xf32, #tpu.memory_space<smem>>
    %83 = vector.broadcast %82 : f32 to vector<8x128xf32>
    %84 = arith.mulf %83, %12 : vector<8x128xf32>
    %85 = arith.addf %81, %84 : vector<8x128xf32>
    %c3_37 = arith.constant 3 : index
    %c2_38 = arith.constant 2 : index
    %86 = memref.load %arg3[%c3_37, %c2_38] : memref<4x4xf32, #tpu.memory_space<smem>>
    %87 = vector.broadcast %86 : f32 to vector<8x128xf32>
    %88 = arith.mulf %87, %18 : vector<8x128xf32>
    %89 = arith.addf %85, %88 : vector<8x128xf32>
    %c3_39 = arith.constant 3 : index
    %c3_40 = arith.constant 3 : index
    %90 = memref.load %arg3[%c3_39, %c3_40] : memref<4x4xf32, #tpu.memory_space<smem>>
    %91 = vector.broadcast %90 : f32 to vector<8x128xf32>
    %92 = arith.mulf %91, %24 : vector<8x128xf32>
    %93 = arith.addf %89, %92 : vector<8x128xf32>
    %c3_41 = arith.constant 3 : index
    %94 = memref.load %arg4[%c3_41] : memref<4xf32, #tpu.memory_space<smem>>
    %95 = vector.broadcast %94 : f32 to vector<8x128xf32>
    %96 = arith.addf %93, %95 : vector<8x128xf32>
    %97 = arith.addf %6, %42 : vector<8x128xf32>
    %98 = arith.addf %12, %60 : vector<8x128xf32>
    %99 = arith.addf %18, %78 : vector<8x128xf32>
    %100 = arith.addf %24, %96 : vector<8x128xf32>
    %c0_42 = arith.constant 0 : index
    %c0_43 = arith.constant 0 : index
    %101 = memref.load %arg5[%c0_42, %c0_43] : memref<4x4xf32, #tpu.memory_space<smem>>
    %102 = vector.broadcast %101 : f32 to vector<8x128xf32>
    %103 = arith.mulf %102, %97 : vector<8x128xf32>
    %c0_44 = arith.constant 0 : index
    %c1_45 = arith.constant 1 : index
    %104 = memref.load %arg5[%c0_44, %c1_45] : memref<4x4xf32, #tpu.memory_space<smem>>
    %105 = vector.broadcast %104 : f32 to vector<8x128xf32>
    %106 = arith.mulf %105, %98 : vector<8x128xf32>
    %107 = arith.addf %103, %106 : vector<8x128xf32>
    %c0_46 = arith.constant 0 : index
    %c2_47 = arith.constant 2 : index
    %108 = memref.load %arg5[%c0_46, %c2_47] : memref<4x4xf32, #tpu.memory_space<smem>>
    %109 = vector.broadcast %108 : f32 to vector<8x128xf32>
    %110 = arith.mulf %109, %99 : vector<8x128xf32>
    %111 = arith.addf %107, %110 : vector<8x128xf32>
    %c0_48 = arith.constant 0 : index
    %c3_49 = arith.constant 3 : index
    %112 = memref.load %arg5[%c0_48, %c3_49] : memref<4x4xf32, #tpu.memory_space<smem>>
    %113 = vector.broadcast %112 : f32 to vector<8x128xf32>
    %114 = arith.mulf %113, %100 : vector<8x128xf32>
    %115 = arith.addf %111, %114 : vector<8x128xf32>
    %c0_50 = arith.constant 0 : index
    %116 = memref.load %arg6[%c0_50] : memref<4xf32, #tpu.memory_space<smem>>
    %117 = vector.broadcast %116 : f32 to vector<8x128xf32>
    %118 = arith.addf %115, %117 : vector<8x128xf32>
    %c1_51 = arith.constant 1 : index
    %c0_52 = arith.constant 0 : index
    %119 = memref.load %arg5[%c1_51, %c0_52] : memref<4x4xf32, #tpu.memory_space<smem>>
    %120 = vector.broadcast %119 : f32 to vector<8x128xf32>
    %121 = arith.mulf %120, %97 : vector<8x128xf32>
    %c1_53 = arith.constant 1 : index
    %c1_54 = arith.constant 1 : index
    %122 = memref.load %arg5[%c1_53, %c1_54] : memref<4x4xf32, #tpu.memory_space<smem>>
    %123 = vector.broadcast %122 : f32 to vector<8x128xf32>
    %124 = arith.mulf %123, %98 : vector<8x128xf32>
    %125 = arith.addf %121, %124 : vector<8x128xf32>
    %c1_55 = arith.constant 1 : index
    %c2_56 = arith.constant 2 : index
    %126 = memref.load %arg5[%c1_55, %c2_56] : memref<4x4xf32, #tpu.memory_space<smem>>
    %127 = vector.broadcast %126 : f32 to vector<8x128xf32>
    %128 = arith.mulf %127, %99 : vector<8x128xf32>
    %129 = arith.addf %125, %128 : vector<8x128xf32>
    %c1_57 = arith.constant 1 : index
    %c3_58 = arith.constant 3 : index
    %130 = memref.load %arg5[%c1_57, %c3_58] : memref<4x4xf32, #tpu.memory_space<smem>>
    %131 = vector.broadcast %130 : f32 to vector<8x128xf32>
    %132 = arith.mulf %131, %100 : vector<8x128xf32>
    %133 = arith.addf %129, %132 : vector<8x128xf32>
    %c1_59 = arith.constant 1 : index
    %134 = memref.load %arg6[%c1_59] : memref<4xf32, #tpu.memory_space<smem>>
    %135 = vector.broadcast %134 : f32 to vector<8x128xf32>
    %136 = arith.addf %133, %135 : vector<8x128xf32>
    %c2_60 = arith.constant 2 : index
    %c0_61 = arith.constant 0 : index
    %137 = memref.load %arg5[%c2_60, %c0_61] : memref<4x4xf32, #tpu.memory_space<smem>>
    %138 = vector.broadcast %137 : f32 to vector<8x128xf32>
    %139 = arith.mulf %138, %97 : vector<8x128xf32>
    %c2_62 = arith.constant 2 : index
    %c1_63 = arith.constant 1 : index
    %140 = memref.load %arg5[%c2_62, %c1_63] : memref<4x4xf32, #tpu.memory_space<smem>>
    %141 = vector.broadcast %140 : f32 to vector<8x128xf32>
    %142 = arith.mulf %141, %98 : vector<8x128xf32>
    %143 = arith.addf %139, %142 : vector<8x128xf32>
    %c2_64 = arith.constant 2 : index
    %c2_65 = arith.constant 2 : index
    %144 = memref.load %arg5[%c2_64, %c2_65] : memref<4x4xf32, #tpu.memory_space<smem>>
    %145 = vector.broadcast %144 : f32 to vector<8x128xf32>
    %146 = arith.mulf %145, %99 : vector<8x128xf32>
    %147 = arith.addf %143, %146 : vector<8x128xf32>
    %c2_66 = arith.constant 2 : index
    %c3_67 = arith.constant 3 : index
    %148 = memref.load %arg5[%c2_66, %c3_67] : memref<4x4xf32, #tpu.memory_space<smem>>
    %149 = vector.broadcast %148 : f32 to vector<8x128xf32>
    %150 = arith.mulf %149, %100 : vector<8x128xf32>
    %151 = arith.addf %147, %150 : vector<8x128xf32>
    %c2_68 = arith.constant 2 : index
    %152 = memref.load %arg6[%c2_68] : memref<4xf32, #tpu.memory_space<smem>>
    %153 = vector.broadcast %152 : f32 to vector<8x128xf32>
    %154 = arith.addf %151, %153 : vector<8x128xf32>
    %c3_69 = arith.constant 3 : index
    %c0_70 = arith.constant 0 : index
    %155 = memref.load %arg5[%c3_69, %c0_70] : memref<4x4xf32, #tpu.memory_space<smem>>
    %156 = vector.broadcast %155 : f32 to vector<8x128xf32>
    %157 = arith.mulf %156, %97 : vector<8x128xf32>
    %c3_71 = arith.constant 3 : index
    %c1_72 = arith.constant 1 : index
    %158 = memref.load %arg5[%c3_71, %c1_72] : memref<4x4xf32, #tpu.memory_space<smem>>
    %159 = vector.broadcast %158 : f32 to vector<8x128xf32>
    %160 = arith.mulf %159, %98 : vector<8x128xf32>
    %161 = arith.addf %157, %160 : vector<8x128xf32>
    %c3_73 = arith.constant 3 : index
    %c2_74 = arith.constant 2 : index
    %162 = memref.load %arg5[%c3_73, %c2_74] : memref<4x4xf32, #tpu.memory_space<smem>>
    %163 = vector.broadcast %162 : f32 to vector<8x128xf32>
    %164 = arith.mulf %163, %99 : vector<8x128xf32>
    %165 = arith.addf %161, %164 : vector<8x128xf32>
    %c3_75 = arith.constant 3 : index
    %c3_76 = arith.constant 3 : index
    %166 = memref.load %arg5[%c3_75, %c3_76] : memref<4x4xf32, #tpu.memory_space<smem>>
    %167 = vector.broadcast %166 : f32 to vector<8x128xf32>
    %168 = arith.mulf %167, %100 : vector<8x128xf32>
    %169 = arith.addf %165, %168 : vector<8x128xf32>
    %c3_77 = arith.constant 3 : index
    %170 = memref.load %arg6[%c3_77] : memref<4xf32, #tpu.memory_space<smem>>
    %171 = vector.broadcast %170 : f32 to vector<8x128xf32>
    %172 = arith.addf %169, %171 : vector<8x128xf32>
    %173 = arith.addf %97, %118 : vector<8x128xf32>
    %174 = arith.addf %98, %136 : vector<8x128xf32>
    %175 = arith.addf %99, %154 : vector<8x128xf32>
    %176 = arith.addf %100, %172 : vector<8x128xf32>
    %c0_78 = arith.constant 0 : index
    %177 = memref.load %arg7[%c0_78] : memref<4xf32, #tpu.memory_space<smem>>
    %178 = vector.broadcast %177 : f32 to vector<8x128xf32>
    %179 = arith.mulf %178, %173 : vector<8x128xf32>
    %c1_79 = arith.constant 1 : index
    %180 = memref.load %arg7[%c1_79] : memref<4xf32, #tpu.memory_space<smem>>
    %181 = vector.broadcast %180 : f32 to vector<8x128xf32>
    %182 = arith.mulf %181, %174 : vector<8x128xf32>
    %183 = arith.addf %179, %182 : vector<8x128xf32>
    %c2_80 = arith.constant 2 : index
    %184 = memref.load %arg7[%c2_80] : memref<4xf32, #tpu.memory_space<smem>>
    %185 = vector.broadcast %184 : f32 to vector<8x128xf32>
    %186 = arith.mulf %185, %175 : vector<8x128xf32>
    %187 = arith.addf %183, %186 : vector<8x128xf32>
    %c3_81 = arith.constant 3 : index
    %188 = memref.load %arg7[%c3_81] : memref<4xf32, #tpu.memory_space<smem>>
    %189 = vector.broadcast %188 : f32 to vector<8x128xf32>
    %190 = arith.mulf %189, %176 : vector<8x128xf32>
    %191 = arith.addf %187, %190 : vector<8x128xf32>
    %c0_82 = arith.constant 0 : index
    %192 = memref.load %arg8[%c0_82] : memref<1xf32, #tpu.memory_space<smem>>
    %193 = vector.broadcast %192 : f32 to vector<8x128xf32>
    %194 = arith.addf %191, %193 : vector<8x128xf32>
    %c0_83 = arith.constant 0 : index
    %c0_84 = arith.constant 0 : index
    %195 = vector.load %arg10[%c0_83, %c0_84] : memref<8x128xf32, #tpu.memory_space<vmem>>, vector<8x128xf32>
    tpu.vector_store %arg10[%c0_83, %c0_84], %194 {strides = array<i32>} : memref<8x128xf32, #tpu.memory_space<vmem>>, vector<8x128xf32>,
    return
  }
  func.func @transform_0(%arg0: i32, %arg1: memref<4xf32, #tpu.memory_space<smem>>, %arg2: memref<4xf32, #tpu.memory_space<smem>>, %arg3: memref<4x4xf32, #tpu.memory_space<smem>>, %arg4: memref<4xf32, #tpu.memory_space<smem>>, %arg5: memref<4x4xf32, #tpu.memory_space<smem>>, %arg6: memref<4xf32, #tpu.memory_space<smem>>, %arg7: memref<4xf32, #tpu.memory_space<smem>>, %arg8: memref<1xf32, #tpu.memory_space<smem>>) -> (i32, i32) {
    %c0_i32 = arith.constant 0 : i32
    %c0_i32_0 = arith.constant 0 : i32
    return %arg0, %c0_i32 : i32, i32
  }
  func.func @transform_1(%arg0: i32, %arg1: memref<4xf32, #tpu.memory_space<smem>>, %arg2: memref<4xf32, #tpu.memory_space<smem>>, %arg3: memref<4x4xf32, #tpu.memory_space<smem>>, %arg4: memref<4xf32, #tpu.memory_space<smem>>, %arg5: memref<4x4xf32, #tpu.memory_space<smem>>, %arg6: memref<4xf32, #tpu.memory_space<smem>>, %arg7: memref<4xf32, #tpu.memory_space<smem>>, %arg8: memref<1xf32, #tpu.memory_space<smem>>) -> (i32, i32) {
    %c0_i32 = arith.constant 0 : i32
    %c0_i32_0 = arith.constant 0 : i32
    return %arg0, %c0_i32 : i32, i32
  }
}

</mosaic_0001>

<bundles_post_ra>
// kernel: tpu_custom_call.1
= control target key start
LH: loop header
LB: loop body
LE: loop exit
PB: predicated region body
PF: predicated region fallthrough
CT: control target
= control target key end

     0   :  { %s1168_s0 = inlined_call_operand.vmem [shape: f32[4], index: 0, kind: input, shape index: {}]   ;;  %s1169_s8 = inlined_call_operand.hbm [shape: f32[32,128], index: 8, kind: input, shape index: {}]   ;;  %s1170_s9 = inlined_call_operand.hbm [shape: f32[32,128], index: 9, kind: output, shape index: {}]   ;;  %s1171_s1 = inlined_call_operand.vmem [shape: f32[4], index: 1, kind: input, shape index: {}]   ;;  %s1172_s2 = inlined_call_operand.vmem [shape: f32[4,4], index: 2, kind: input, shape index: {}]   ;;  %s1173_s3 = inlined_call_operand.vmem [shape: f32[4], index: 3, kind: input, shape index: {}]   ;;  %s1174_s4 = inlined_call_operand.vmem [shape: f32[4,4], index: 4, kind: input, shape index: {}]   ;;  %s1175_s5 = inlined_call_operand.vmem [shape: f32[4], index: 5, kind: input, shape index: {}]   ;;  %s1176_s6 = inlined_call_operand.vmem [shape: f32[4], index: 6, kind: input, shape index: {}]   ;;  %s1177_s7 = inlined_call_operand.<no memory space> [shape: f32[1], index: 7, kind: input, shape index: {}]  }
   0x1   :  { %s14_s11 = sshll.u32 %s1168_s0, 4  ;;  %s18_s14 = sshll.u32 %s1171_s1, 4  ;;  %s15_s11 = int_to_ptr.vmem [resolvable:$true] %s14_s11  ;;  %s19_s14 = int_to_ptr.vmem [resolvable:$true] %s18_s14 }
   0x2   :  { %s561_s15 = scalar_lea.vmem %s15_s11, 16  ;;  %p566_p1 = scmp.lt.s32.totalorder %s15_s11, %s15_s11 }
   0x3   :  { %p562_p0 = scmp.ne.s32.totalorder %s15_s11, %s561_s15  ;;  %p567_p2 = scmp.lt.s32.totalorder %s561_s15, %s561_s15 }
   0x5   :  { %p568_p3 = por %p567_p2, %p566_p1 }
   0x7   :  { %p569_p4 = pnand %p568_p3, %p562_p0 }
   0x9   :  { %572 = shalt.err (!%p569_p4)  }
   0xa   :  { %s745_s16 = smov [#allocation3]   ;;  %s573_s17 = scalar_lea.vmem %s19_s14, 16 }
   0xb   :  { %17 = dma.vmem_to_smem %s15_s11, 16, %s745_s16, [#allocation2] }
   0xc   :  { %p574_p5 = scmp.ne.s32.totalorder %s19_s14, %s573_s17  ;;  %p578_p6 = scmp.lt.s32.totalorder %s19_s14, %s19_s14 }
   0xd   :  { %p579_p7 = scmp.lt.s32.totalorder %s573_s17, %s573_s17 }
   0xf   :  { %p580_p8 = por %p579_p7, %p578_p6 }
  0x11   :  { %p581_p9 = pnand %p580_p8, %p574_p5 }
  0x13   :  { %584 = shalt.err (!%p581_p9)  }
  0x14   :  { %s746_s0 = smov [#allocation4]   ;;  %s22_s19 = sshll.u32 %s1172_s2, 4  ;;  %s23_s19 = int_to_ptr.vmem [resolvable:$true] %s22_s19 }
  0x15   :  { %21 = dma.vmem_to_smem %s19_s14, 16, %s746_s0, [#allocation2] }
  0x16   :  { %s26_s22 = sshll.u32 %s1173_s3, 4  ;;  %s585_s23 = scalar_lea.vmem %s23_s19, 64  ;;  %s27_s22 = int_to_ptr.vmem [resolvable:$true] %s26_s22 }
  0x17   :  { %p586_p10 = scmp.ne.s32.totalorder %s23_s19, %s585_s23  ;;  %p590_p11 = scmp.lt.s32.totalorder %s23_s19, %s23_s19 }
  0x18   :  { %p591_p12 = scmp.lt.s32.totalorder %s585_s23, %s585_s23 }
  0x1a   :  { %p592_p13 = por %p591_p12, %p590_p11 }
  0x1c   :  { %p593_p0 = pnand %p592_p13, %p586_p10 }
  0x1e   :  { %596 = shalt.err (!%p593_p0)  }
  0x1f   :  { %s747_s24 = smov [#allocation5]   ;;  %s597_s25 = scalar_lea.vmem %s27_s22, 16 }
  0x20   :  { %25 = dma.vmem_to_smem %s23_s19, 64, %s747_s24, [#allocation2] }
  0x21   :  { %p598_p1 = scmp.ne.s32.totalorder %s27_s22, %s597_s25  ;;  %p602_p2 = scmp.lt.s32.totalorder %s27_s22, %s27_s22 }
  0x22   :  { %p603_p3 = scmp.lt.s32.totalorder %s597_s25, %s597_s25 }
  0x24   :  { %p604_p4 = por %p603_p3, %p602_p2 }
  0x26   :  { %p605_p5 = pnand %p604_p4, %p598_p1 }
  0x28   :  { %608 = shalt.err (!%p605_p5)  }
  0x29   :  { %s748_s2 = smov [#allocation6]   ;;  %s30_s27 = sshll.u32 %s1174_s4, 4  ;;  %s31_s27 = int_to_ptr.vmem [resolvable:$true] %s30_s27 }
  0x2a   :  { %29 = dma.vmem_to_smem %s27_s22, 16, %s748_s2, [#allocation2] }
  0x2b   :  { %s34_s30 = sshll.u32 %s1175_s5, 4  ;;  %s609_s10 = scalar_lea.vmem %s31_s27, 64  ;;  %s35_s30 = int_to_ptr.vmem [resolvable:$true] %s34_s30 }
  0x2c   :  { %p610_p6 = scmp.ne.s32.totalorder %s31_s27, %s609_s10  ;;  %p614_p7 = scmp.lt.s32.totalorder %s31_s27, %s31_s27 }
  0x2d   :  { %p615_p8 = scmp.lt.s32.totalorder %s609_s10, %s609_s10 }
  0x2f   :  { %p616_p9 = por %p615_p8, %p614_p7 }
  0x31   :  { %p617_p10 = pnand %p616_p9, %p610_p6 }
  0x33   :  { %620 = shalt.err (!%p617_p10)  }
  0x34   :  { %s749_s11 = smov [#allocation7]   ;;  %s621_s12 = scalar_lea.vmem %s35_s30, 16 }
  0x35   :  { %33 = dma.vmem_to_smem %s31_s27, 64, %s749_s11, [#allocation2] }
  0x36   :  { %p622_p11 = scmp.ne.s32.totalorder %s35_s30, %s621_s12  ;;  %p626_p12 = scmp.lt.s32.totalorder %s35_s30, %s35_s30 }
  0x37   :  { %p627_p13 = scmp.lt.s32.totalorder %s621_s12, %s621_s12 }
  0x39   :  { %p628_p0 = por %p627_p13, %p626_p12 }
  0x3b   :  { %p629_p1 = pnand %p628_p0, %p622_p11 }
  0x3d   :  { %632 = shalt.err (!%p629_p1)  }
  0x3e   :  { %s750_s4 = smov [#allocation8]   ;;  %s38_s14 = sshll.u32 %s1176_s6, 4  ;;  %s39_s14 = int_to_ptr.vmem [resolvable:$true] %s38_s14 }
  0x3f   :  { %37 = dma.vmem_to_smem %s35_s30, 16, %s750_s4, [#allocation2] }
  0x40   :  { %42 = sst [smem:[#allocation10]] %s1177_s7  ;;  %s633_s17 = scalar_lea.vmem %s39_s14, 16 }
  0x41   :  { %p634_p2 = scmp.ne.s32.totalorder %s39_s14, %s633_s17  ;;  %p638_p3 = scmp.lt.s32.totalorder %s39_s14, %s39_s14 }
  0x42   :  { %p639_p4 = scmp.lt.s32.totalorder %s633_s17, %s633_s17 }
  0x44   :  { %p640_p5 = por %p639_p4, %p638_p3 }
  0x46   :  { %p641_p6 = pnand %p640_p5, %p634_p2 }
  0x48   :  { %644 = shalt.err (!%p641_p6)  }
  0x49   :  { %s751_s0 = smov [#allocation9]  }
  0x4a   :  { %41 = dma.vmem_to_smem %s39_s14, 16, %s751_s0, [#allocation2] }
  0x4b   :  { %719 = dma.done.wait [#allocation2], 208 }
  0x4c   :  { %720 = vsyncadd [#allocation2], 4294967088 }
  0x4d   :  { %44 = sfence }
  0x4e   :  { %45 = vsyncpa [#allocation12], 0 }
  0x4f   :  { %47 = vsyncpa [#allocation12 + $0x1], 0 }
  0x50   :  { %48 = vsyncpa [#allocation13], 0 }
  0x51   :  { %50 = vsyncpa [#allocation13 + $0x1], 0  ;;  %s828_s6 = smov 0   ;;  %s830_s1 = smov 0  }
  0x52   :  { %s832_s7 = smov 0   ;;  %s834_s18 = smov 0  }
  0x53 LB: > { %s849_s19 = sadd.s32 4294967295, %s743_s18   ;;  %s451_s20 = sadd.s32 4294967294, %s743_s18   ;;  %s743_s18 = sphi %s834_s18, %s1191_s18   ;;  %s739_s7 = sphi %s832_s7, %s1190_s7   ;;  %s735_s1 = sphi %s830_s1, %s1189_s1   ;;  %s731_s6 = sphi %s828_s6, %s1188_s6  }
  0x54   : > { %s853_s21 = sadd.s32 1, %s743_s18   ;;  %s63_s22 = sadd.s32 1, %s739_s7 }
  0x55   : > { %s60_s23 = ssub.s32 %s743_s18, %s853_s21  ;;  %p70_p7 = scmp.ne.s32.totalorder %s739_s7, %s735_s1 }
  0x56   : > { %p61_p8 = scmp.eq.s32.totalorder %s60_s23, 0  ;;  %p71_p9 = scmp.eq.s32.totalorder %s743_s18, 0 }
  0x57   : > { %p76_p10 = scmp.ne.s32.totalorder %s735_s1, %s731_s6  ;;  %p77_p11 = scmp.eq.s32.totalorder %s849_s19, 0 }
  0x58   : > { %s865_s24 = scalar_select %p61_p8, %s739_s7, %s63_s22  }
  0x59   : > { %p867_p12 = por %p71_p9, %p70_p7  ;;  %p871_p13 = por %p77_p11, %p76_p10 }
  0x5a   : > { %p100_p0 = scmp.eq.s32.totalorder %s849_s19, 3  ;;  %p106_p1 = scmp.eq.s32.totalorder %s451_s20, 3 }
  0x5b   : > { %p520_p2 = scmp.lt.s32.totalorder %s743_s18, 4  ;;  %s126_s27 = sand.u32 1, %s739_s7  }
  0x5c   : > { %p877_p3 = por %p100_p0, %p70_p7  ;;  %p881_p4 = por %p106_p1, %p76_p10 }
  0x5d   : > { %s455_s28 = sshll.u32 %s743_s18, 7  ;;  %s454_s29 = sshll.u32 %s126_s27, 3 }
  0x5e   : > { %s1181_s3 = scalar_select %p877_p3, 1, 0 }
  0x5f   : > { %s1182_s26 = scalar_select %p881_p4, 1, 0 }
  0x60   : > { %s890_s11 = scalar_lea.hbm %s1169_s8, %s455_s28  ;;  %s130_s12 = scalar_lea.vmem [#allocation11], %s454_s29 }
  0x61   : > { %s137_s4 = sshll.u32 %s130_s12, 4  ;;  %p894_p5 = pnand %p520_p2, %p867_p12  ;;  %s898_s4 = int_to_ptr.vmem [resolvable:$true] %s137_s4 }
  0x62   : > { %s127_s13 = scalar_lea.sflag [#allocation12], %s126_s27  ;;  %s645_s14 = scalar_lea.hbm %s890_s11, 128 }
  0x63   : > { %p646_p8 = scmp.ne.s32.totalorder %s890_s11, %s645_s14  ;;  %p647_p9 = pneg %p894_p5 }
  0x64   : > { %s650_s17 = scalar_lea.hbm %s1169_s8, 512  ;;  %p651_p12 = scmp.lt.u32.totalorder %s890_s11, %s1169_s8 }
  0x65   : > { %p648_p10 = pnand %p647_p9, %p646_p8  ;;  %p652_p0 = scmp.lt.u32.totalorder %s650_s17, %s645_s14 }
  0x66   : > { %p654_p2 = scmp.lt.u32.totalorder %s645_s14, %s890_s11 }
  0x67   : > { %p649_p11 = pneg %p648_p10  ;;  %p653_p1 = por %p652_p0, %p651_p12 }
  0x69   : > { %p655_p6 = por %p654_p2, %p653_p1 }
  0x6b   : > { %p656_p7 = pnand %p655_p6, %p649_p11 }
  0x6d   : > { %659 = shalt.err (!%p656_p7)
}
  0x6e   : > { %s660_s22 = scalar_lea.vmem %s898_s4, 128  ;;  %s752_s23 = smov [#allocation11]  }
  0x6f   : > { %p661_p8 = scmp.ne.s32.totalorder %s898_s4, %s660_s22  ;;  %s665_s25 = sshll.u32 %s752_s23, 4  ;;  %s666_s25 = int_to_ptr.vmem [resolvable:$false] %s665_s25 }
  0x70   : > { %s667_s27 = scalar_lea.vmem %s666_s25, 256  ;;  %p668_p3 = scmp.lt.s32.totalorder %s898_s4, %s666_s25 }
  0x71   : > { %p663_p10 = pnand %p661_p8, %p647_p9  ;;  %p669_p12 = scmp.lt.s32.totalorder %s667_s27, %s660_s22 }
  0x73   : > { %p664_p4 = pneg %p663_p10  ;;  %p670_p0 = por %p669_p12, %p668_p3 }
  0x75   : > { %p671_p1 = pnand %p670_p0, %p664_p4 }
  0x77   : > { %674 = shalt.err (!%p671_p1)
}
  0x78   : > { %515 = dma.hbm_to_vmem [thread:$0]  (!%p894_p5), %s890_s11, 128, %s898_s4, %s127_s13  }
  0x79   : > { %p1184_p6 = scmp.lt.s32.totalorder %s743_s18, 5  ;;  %p1185_p7 = scmp.ge.s32.totalorder %s743_s18, 1 }
  0x7b   : > { %p143_p9 = pnand %p1185_p7, %p1184_p6 }
  0x7c   : > { %s932_s28 = sand.u32 (!%p143_p9), 1, %s735_s1  }
  0x7d   : > { %146 = sbr.rel (%p143_p9) target bundleno = 200 (0xc8), region = 24  ;;  %s457_s29 = sshll.u32 (!%p143_p9), %s932_s28, 3 }
  0x7e   : > { %s149_s30 = scalar_lea.sflag (!%p143_p9), [#allocation12], %s932_s28  ;;  %s152_s10 = scalar_lea.vmem (!%p143_p9), [#allocation11], %s457_s29 }
  0x84   : > { %722 = dma.done.wait (%p871_p13), %s149_s30, 128  }
  0x85   : > { %724 = vsyncadd (%p871_p13), %s149_s30, 4294967168  ;;  %s172_s11 = sld [smem:[#allocation3]]  ;;  %s459_s4 = sld [smem:[#allocation3 + $0x1]]  ;;  %v171_v0 = vld [vmem:[%s152_s10] sm:$0xff] }
  0x86   : > { %s175_s12 = sld [smem:[#allocation4]]  ;;  %s460_s5 = sld [smem:[#allocation4 + $0x1]] }
  0x87   : > { %s461_s13 = sld [smem:[#allocation3 + $0x2]]  ;;  %s463_s15 = sld [smem:[#allocation3 + $0x3]] }
  0x88   : > { %s942_s14 = sld [smem:[#allocation4 + $0x2]]  ;;  %s944_s16 = sld [smem:[#allocation4 + $0x3]] }
  0x89   : > { %s946_s17 = sld [smem:[#allocation5]]  ;;  %s948_s0 = sld [smem:[#allocation5 + $0x1]] }
  0x8a   : > { %s950_s20 = sld [smem:[#allocation5 + $0x2]]  ;;  %s952_s22 = sld [smem:[#allocation5 + $0x3]] }
  0x8b   : > { %v173_v1 = vstv %s172_s11  ;;  %s954_s2 = sld [smem:[#allocation6]]  ;;  %v179_v4 = vstv %s459_s4  ;;  %s958_s25 = sld [smem:[#allocation5 + $0x81]] }
  0x8c   : > { %v176_v2 = vstv %s175_s12  ;;  %s956_s23 = sld [smem:[#allocation5 + $0x80]]  ;;  %v174_v3 = vmul.f32 %v173_v1, %v171_v0  ;;  %v182_v5 = vstv %s460_s5  ;;  %s960_s27 = sld [smem:[#allocation5 + $0x82]]  ;;  %v180_v6 = vmul.f32 %v179_v4, %v171_v0 }
  0x8d   : > { %v185_v7 = vstv %s461_s13  ;;  %s963_s30 = sld [smem:[#allocation5 + $0x83]]  ;;  %s965_s10 = sld [smem:[#allocation6 + $0x1]]  ;;  %v191_v11 = vstv %s463_s15 }
  0x8e   : > { %v188_v8 = vstv %s942_s14  ;;  %v967_v9 = vadd.f32 %v176_v2, %v174_v3  ;;  %v186_v10 = vmul.f32 %v185_v7, %v171_v0  ;;  %v194_v12 = vstv %s944_s16  ;;  %s970_s11 = sld [smem:[#allocation5 + $0x100]]  ;;  %s972_s12 = sld [smem:[#allocation5 + $0x101]] }
  0x8f   : > { %v974_v13 = vadd.f32 %v182_v5, %v180_v6  ;;  %v192_v14 = vmul.f32 %v191_v11, %v171_v0  ;;  %v197_v15 = vstv %s946_s17  ;;  %v200_v16 = vstv %s948_s0  ;;  %s978_s4 = sld [smem:[#allocation5 + $0x102]]  ;;  %s980_s5 = sld [smem:[#allocation5 + $0x103]] }
  0x90   : > { %v982_v17 = vadd.f32 %v188_v8, %v186_v10  ;;  %v198_v18 = vmul.f32 %v197_v15, %v967_v9  ;;  %v204_v19 = vstv %s950_s20  ;;  %v208_v20 = vstv %s952_s22  ;;  %s987_s13 = sld [smem:[#allocation5 + $0x180]]  ;;  %s993_s14 = sld [smem:[#allocation5 + $0x181]] }
  0x91   : > { %v989_v21 = vadd.f32 %v194_v12, %v192_v14  ;;  %v201_v22 = vmul.f32 %v200_v16, %v974_v13  ;;  %s995_s15 = sld [smem:[#allocation5 + $0x182]]  ;;  %v218_v26 = vstv %s958_s25  ;;  %s1003_s17 = sld [smem:[#allocation5 + $0x183]]  ;;  %v212_v32 = vstv %s954_s2 }
  0x92   : > { %v215_v23 = vstv %s956_s23  ;;  %v205_v24 = vmul.f32 %v204_v19, %v982_v17  ;;  %v222_v27 = vstv %s960_s27  ;;  %s1001_s16 = sld [smem:[#allocation6 + $0x2]]  ;;  %v219_v30 = vmul.f32 %v218_v26, %v974_v13  ;;  %s1008_s0 = sld [smem:[#allocation6 + $0x3]] }
  0x93   : > { %v216_v25 = vmul.f32 %v215_v23, %v967_v9  ;;  %v202_v28 = vadd.f32 %v201_v22, %v198_v18  ;;  %v209_v29 = vmul.f32 %v208_v20, %v989_v21  ;;  %v223_v31 = vmul.f32 %v222_v27, %v982_v17  ;;  %s1014_s20 = sld [smem:[#allocation7]]  ;;  %s1016_s22 = sld [smem:[#allocation7 + $0x1]] }
  0x94   : > { %v226_v33 = vstv %s963_s30  ;;  %v233_v34 = vstv %s970_s11  ;;  %v236_v35 = vstv %s972_s12  ;;  %s1020_s23 = sld [smem:[#allocation7 + $0x2]]  ;;  %s1022_s25 = sld [smem:[#allocation7 + $0x3]]  ;;  %v230_v40 = vstv %s965_s10 }
  0x95   : > { %v206_v36 = vadd.f32 %v205_v24, %v202_v28  ;;  %v220_v37 = vadd.f32 %v219_v30, %v216_v25  ;;  %v227_v38 = vmul.f32 %v226_v33, %v989_v21  ;;  %v234_v39 = vmul.f32 %v233_v34, %v967_v9  ;;  %s1028_s2 = sld [smem:[#allocation7 + $0x80]]  ;;  %s1030_s27 = sld [smem:[#allocation7 + $0x81]] }
  0x96   : > { %v237_v41 = vmul.f32 %v236_v35, %v974_v13  ;;  %v240_v42 = vstv %s978_s4  ;;  %v244_v43 = vstv %s980_s5  ;;  %s1034_s30 = sld [smem:[#allocation8]]  ;;  %v251_v49 = vstv %s987_s13  ;;  %s1039_s10 = sld [smem:[#allocation7 + $0x82]] }
  0x97   : > { %v210_v44 = vadd.f32 %v209_v29, %v206_v36  ;;  %v224_v45 = vadd.f32 %v223_v31, %v220_v37  ;;  %v241_v46 = vmul.f32 %v240_v42, %v982_v17  ;;  %v245_v47 = vmul.f32 %v244_v43, %v989_v21  ;;  %s1041_s11 = sld [smem:[#allocation7 + $0x83]]  ;;  %s1045_s12 = sld [smem:[#allocation7 + $0x100]] }
  0x98   : > { %v238_v48 = vadd.f32 %v237_v41, %v234_v39  ;;  %v254_v50 = vstv %s993_s14  ;;  %v258_v51 = vstv %s995_s15  ;;  %v252_v54 = vmul.f32 %v251_v49, %v967_v9  ;;  %s1050_s4 = sld [smem:[#allocation7 + $0x101]]  ;;  %s1056_s5 = sld [smem:[#allocation7 + $0x102]] }
  0x99   : > { %v213_v52 = vadd.f32 %v212_v32, %v210_v44  ;;  %v228_v53 = vadd.f32 %v227_v38, %v224_v45  ;;  %v255_v55 = vmul.f32 %v254_v50, %v974_v13  ;;  %v248_v57 = vstv %s1001_s16  ;;  %s1058_s13 = sld [smem:[#allocation7 + $0x103]]  ;;  %s1063_s14 = sld [smem:[#allocation8 + $0x1]] }
  0x9a   : > { %v242_v56 = vadd.f32 %v241_v46, %v238_v48  ;;  %v259_v58 = vmul.f32 %v258_v51, %v982_v17  ;;  %v262_v59 = vstv %s1003_s17  ;;  %v266_v1 = vstv %s1008_s0  ;;  %s1070_s15 = sld [smem:[#allocation7 + $0x180]]  ;;  %s1072_s16 = sld [smem:[#allocation7 + $0x181]] }
  0x9b   : > { %v231_v60 = vadd.f32 %v230_v40, %v228_v53  ;;  %v256_v61 = vadd.f32 %v255_v55, %v252_v54  ;;  %v263_v62 = vmul.f32 %v262_v59, %v989_v21  ;;  %v1054_v63 = vadd.f32 %v213_v52, %v967_v9  ;;  %s1077_s17 = sld [smem:[#allocation7 + $0x182]]  ;;  %s1079_s0 = sld [smem:[#allocation7 + $0x183]] }
  0x9c   : > { %v246_v0 = vadd.f32 %v245_v47, %v242_v56  ;;  %v273_v2 = vstv %s1014_s20  ;;  %v276_v3 = vstv %s1016_s22  ;;  %v280_v7 = vstv %s1020_s23  ;;  %s1088_s20 = sld [smem:[#allocation8 + $0x2]]  ;;  %s1093_s22 = sld [smem:[#allocation9]] }
  0x9d   : > { %v260_v4 = vadd.f32 %v259_v58, %v256_v61  ;;  %v1066_v5 = vadd.f32 %v231_v60, %v974_v13  ;;  %v274_v6 = vmul.f32 %v273_v2, %v1054_v63  ;;  %v284_v9 = vstv %s1022_s25  ;;  %s1095_s23 = sld [smem:[#allocation9 + $0x1]]  ;;  %s1102_s25 = sld [smem:[#allocation9 + $0x2]] }
  0x9e   : > { %v249_v8 = vadd.f32 %v248_v57, %v246_v0  ;;  %v291_v10 = vstv %s1028_s2  ;;  %v294_v11 = vstv %s1030_s27  ;;  %v288_v18 = vstv %s1034_s30  ;;  %s1104_s2 = sld [smem:[#allocation8 + $0x3]]  ;;  %s363_s30 = sld [smem:[#allocation10]] }
  0x9f   : > { %v264_v12 = vadd.f32 %v263_v62, %v260_v4  ;;  %v277_v13 = vmul.f32 %v276_v3, %v1066_v5  ;;  %v292_v14 = vmul.f32 %v291_v10, %v1054_v63  ;;  %v295_v15 = vmul.f32 %v294_v11, %v1066_v5  ;;  %s503_s27 = sld [smem:[#allocation9 + $0x3]]  ;;  %p1186_p3 = scmp.ne.s32.totalorder %s1181_s3, 0 }
  0xa0   : > { %v270_v16 = vadd.f32 %v249_v8, %v982_v17  ;;  %v298_v19 = vstv %s1039_s10  ;;  %v302_v20 = vstv %s1041_s11  ;;  %v309_v25 = vstv %s1045_s12  ;;  %s505_s10 = sshll.u32 %s849_s19, 7  ;;  %s170_s11 = scalar_lea.vmem [#allocation14], %s457_s29 }
  0xa1   : > { %v267_v22 = vadd.f32 %v266_v1, %v264_v12  ;;  %v278_v23 = vadd.f32 %v277_v13, %v274_v6  ;;  %v296_v24 = vadd.f32 %v295_v15, %v292_v14  ;;  %v310_v28 = vmul.f32 %v309_v25, %v1054_v63  ;;  %s381_s12 = sshll.u32 %s170_s11, 4  ;;  %s753_s19 = smov [#allocation14]   ;;  %s1127_s12 = int_to_ptr.vmem [resolvable:$true] %s381_s12 }
  0xa2   : > { %v281_v26 = vmul.f32 %v280_v7, %v270_v16  ;;  %v299_v27 = vmul.f32 %v298_v19, %v270_v16  ;;  %v312_v29 = vstv %s1050_s4  ;;  %v316_v31 = vstv %s1056_s5  ;;  %s679_s29 = sshll.u32 %s753_s19, 4  ;;  %s680_s29 = int_to_ptr.vmem [resolvable:$false] %s679_s29 }
  0xa3   : > { %v271_v17 = vadd.f32 %v267_v22, %v989_v21  ;;  %v313_v30 = vmul.f32 %v312_v29, %v1066_v5  ;;  %v320_v32 = vstv %s1058_s13  ;;  %v306_v35 = vstv %s1063_s14  ;;  %s1125_s13 = scalar_lea.hbm %s1170_s9, %s505_s10  ;;  %s368_s14 = scalar_lea.sflag [#allocation13], %s932_s28 }
  0xa4   : > { %v282_v33 = vadd.f32 %v281_v26, %v278_v23  ;;  %v300_v34 = vadd.f32 %v299_v27, %v296_v24  ;;  %v317_v36 = vmul.f32 %v316_v31, %v270_v16  ;;  %v327_v21 = vstv %s1070_s15  ;;  %s675_s15 = scalar_lea.vmem %s1127_s12, 128  ;;  %p682_p11 = scmp.lt.s32.totalorder %s1127_s12, %s680_s29 }
  0xa5   : > { %v285_v37 = vmul.f32 %v284_v9, %v271_v17  ;;  %v303_v38 = vmul.f32 %v302_v20, %v271_v17  ;;  %v314_v39 = vadd.f32 %v313_v30, %v310_v28  ;;  %v321_v40 = vmul.f32 %v320_v32, %v271_v17  ;;  %p676_p13 = scmp.ne.s32.totalorder %s1127_s12, %s675_s15 }
  0xa6   : > { %v330_v41 = vstv %s1072_s16  ;;  %v334_v42 = vstv %s1077_s17  ;;  %v338_v43 = vstv %s1079_s0  ;;  %v328_v47 = vmul.f32 %v327_v21, %v1054_v63  ;;  %s681_s16 = scalar_lea.vmem %s680_s29, 256 }
  0xa7   : > { %v286_v44 = vadd.f32 %v285_v37, %v282_v33  ;;  %v304_v45 = vadd.f32 %v303_v38, %v300_v34  ;;  %v318_v46 = vadd.f32 %v317_v36, %v314_v39  ;;  %v324_v48 = vstv %s1088_s20  ;;  %p677_p4 = pnand %p676_p13, %p1186_p3  ;;  %p683_p2 = scmp.lt.s32.totalorder %s681_s16, %s675_s15 }
  0xa8   : > { %v331_v49 = vmul.f32 %v330_v41, %v1066_v5  ;;  %v335_v50 = vmul.f32 %v334_v42, %v270_v16  ;;  %v339_v55 = vmul.f32 %v338_v43, %v271_v17  ;;  %v349_v56 = vstv %s1093_s22 }
  0xa9   : > { %v289_v51 = vadd.f32 %v288_v18, %v286_v44  ;;  %v307_v52 = vadd.f32 %v306_v35, %v304_v45  ;;  %v322_v53 = vadd.f32 %v321_v40, %v318_v46  ;;  %v352_v57 = vstv %s1095_s23  ;;  %p678_p5 = pneg %p677_p4  ;;  %p684_p8 = por %p683_p2, %p682_p11 }
  0xaa   : > { %v332_v54 = vadd.f32 %v331_v49, %v328_v47  ;;  %v356_v62 = vstv %s1102_s25  ;;  %v342_v0 = vstv %s1104_s2  ;;  %v360_v9 = vstv %s503_s27 }
  0xab   : > { %v325_v58 = vadd.f32 %v324_v48, %v322_v53  ;;  %v344_v59 = vadd.f32 %v289_v51, %v1054_v63  ;;  %v345_v60 = vadd.f32 %v307_v52, %v1066_v5  ;;  %v364_v5 = vstv %s363_s30  ;;  %p685_p10 = pnand %p684_p8, %p678_p5 }
  0xac   : > { %v336_v61 = vadd.f32 %v335_v50, %v332_v54 }
  0xad   : > { %v346_v1 = vadd.f32 %v325_v58, %v270_v16  ;;  %v350_v2 = vmul.f32 %v349_v56, %v344_v59  ;;  %v353_v3 = vmul.f32 %v352_v57, %v345_v60 }
  0xae   : > { %v340_v4 = vadd.f32 %v339_v55, %v336_v61 }
  0xaf   : > { %v354_v6 = vadd.f32 %v353_v3, %v350_v2  ;;  %v357_v7 = vmul.f32 %v356_v62, %v346_v1 }
  0xb0   : > { %v343_v8 = vadd.f32 %v342_v0, %v340_v4 }
  0xb1   : > { %v358_v63 = vadd.f32 %v357_v7, %v354_v6 }
  0xb2   : > { %v347_v10 = vadd.f32 %v343_v8, %v271_v17 }
  0xb4   : > { %v361_v11 = vmul.f32 %v360_v9, %v347_v10 }
  0xb6   : > { %v362_v12 = vadd.f32 %v361_v11, %v358_v63 }
  0xb8   : > { %v365_v13 = vadd.f32 %v364_v5, %v362_v12 }
  0xba   : > { %366 = vst [vmem:[%s170_s11] sm:$0xff] %v365_v13 }
  0xbb   : > { %688 = shalt.err (!%p685_p10)
}
  0xbc   : > { %s689_s28 = scalar_lea.hbm %s1125_s13, 128  ;;  %s693_s20 = scalar_lea.hbm %s1170_s9, 512 }
  0xbd   : > { %p690_p12 = scmp.ne.s32.totalorder %s1125_s13, %s689_s28  ;;  %p694_p6 = scmp.lt.u32.totalorder %s1125_s13, %s1170_s9 }
  0xbe   : > { %p695_p7 = scmp.lt.u32.totalorder %s693_s20, %s689_s28  ;;  %p697_p13 = scmp.lt.u32.totalorder %s689_s28, %s1125_s13 }
  0xbf   : > { %p691_p0 = pnand %p690_p12, %p1186_p3 }
  0xc0   : > { %p696_p9 = por %p695_p7, %p694_p6 }
  0xc1   : > { %p692_p1 = pneg %p691_p0 }
  0xc2   : > { %p698_p4 = por %p697_p13, %p696_p9 }
  0xc4   : > { %p699_p5 = pnand %p698_p4, %p692_p1 }
  0xc6   : > { %702 = shalt.err (!%p699_p5)
}
  0xc7   : > { %510 = dma.vmem_to_hbm [thread:$0]  (%p1186_p3), %s1127_s12, 128, %s1125_s13, %s368_s14  }
  0xc8 PF: > { %p521_p11 = scmp.ge.s32.totalorder %s743_s18, 2  ;;  %s393_s25 = sand.u32 1, %s731_s6  }
  0xc9   : > { %p1187_p2 = scmp.ne.s32.totalorder %s1182_s26, 0  ;;  %s394_s2 = scalar_lea.sflag [#allocation13], %s393_s25 }
  0xcb   : > { %p517_p8 = pnand %p521_p11, %p1187_p2 }
  0xcd   : > { %726 = dma.done.wait (!%p517_p8), %s394_s2, 128  }
  0xce   : > { %728 = vsyncadd (!%p517_p8), %s394_s2, 4294967168  ;;  %p53_p10 = scmp.ge.s32.totalorder %s853_s21, 6   ;;  %s1188_s6 = smov %s735_s1 }
  0xcf   : > { %s1189_s1 = smov %s739_s7  ;;  %s1190_s7 = smov %s865_s24 }
  0xd0   : > { %s1191_s18 = smov %s853_s21  ;;  %55 = sbr.rel (!%p53_p10) target bundleno = 83 (0x53), region = 69 }
  0xd7   :  { %399 = vsyncpa [#allocation12], 1 }
  0xd8   :  { %401 = vsyncpa [#allocation12 + $0x1], 1 }
  0xd9   :  { %402 = vsyncpa [#allocation13], 1 }
  0xda   :  { %404 = vsyncpa [#allocation13 + $0x1], 1 }

</bundles_post_ra>
